<compile_context>
chip_gen: v6e
topology: v6e:2x2x1
jax: 0.10.0
libtpu: 0.0.40
codegen_flags: <defaults>
</compile_context>

<pallas_src>
import functools

import jax
import jax.numpy as jnp
from jax.experimental import pallas as pl
from jax.experimental.pallas import tpu as pltpu

LN_EPS = 1e-5
LANE = 128


def _round_up(n, m):
    return ((n + m - 1) // m) * m


def _sublane_pack(dtype):
    bits = jnp.dtype(dtype).itemsize * 8
    if bits >= 32:
        return 8
    if bits == 16:
        return 16
    return 32


def _pad_axis(a, axis, target):
    pad = target - a.shape[axis]
    if pad <= 0:
        return a
    widths = [(0, 0)] * a.ndim
    widths[axis] = (0, pad)
    return jnp.pad(a, widths)


def _largest_dividing_tile(n, sub, max_tile):
    """Largest multiple of `sub` that divides `n` and is <= max_tile (or None)."""
    best = None
    t = sub
    limit = min(n, max_tile)
    while t <= limit:
        if n % t == 0:
            best = t
        t += sub
    return best


def _positional_linear_kernel(x_ref, w_ref, pe_ref, g_ref, b_ref, o_ref, *,
                              out_features, padded_features):
    # x_ref:  (TR, In)  fused (batch*seq) row tile, true contraction width (no K pad)
    # w_ref:  (In, Np)  weight in (In, Out) layout, Out zero-padded to a lane multiple
    # pe_ref: (TR, Np)  positional embedding with the linear bias pre-folded in
    # g_ref:  (1, Np)   layernorm gamma (zero-padded)
    # b_ref:  (1, Np)   layernorm beta  (zero-padded)
    # o_ref:  (TR, Np)
    y = jnp.dot(x_ref[...], w_ref[...], preferred_element_type=jnp.float32)
    y = y + pe_ref[...].astype(jnp.float32)

    # Two-pass LayerNorm over the true feature count. Padded lanes of y are exactly
    # zero (zero-padded weight/pe columns), so the mean is exact; the centered values
    # in padded lanes are masked before squaring so the variance is exact as well.
    inv_n = 1.0 / out_features
    mean = jnp.sum(y, axis=-1, keepdims=True) * inv_n
    centered = y - mean
    if padded_features != out_features:
        lane = jax.lax.broadcasted_iota(jnp.int32, y.shape, 1)
        centered = jnp.where(lane < out_features, centered, 0.0)
    var = jnp.sum(centered * centered, axis=-1, keepdims=True) * inv_n
    y = centered * jax.lax.rsqrt(var + LN_EPS)
    y = y * g_ref[...].astype(jnp.float32) + b_ref[...].astype(jnp.float32)
    o_ref[...] = y.astype(o_ref.dtype)


def positional_linear(x, weight, bias, pos_emb, gamma, beta, *,
                      max_row_tile=512, mxu_dtype=None):
    """x: (B, S, In); weight: (Out, In) torch-layout; bias: (Out,);
    pos_emb: (1, S, Out); gamma/beta: (Out,). Returns (B, S, Out)."""
    B, S, In = x.shape
    Out = weight.shape[0]
    rows = B * S
    sub = _sublane_pack(x.dtype)
    Np = _round_up(Out, LANE)  # output lanes padded -> dense (unmasked) stores

    # Fuse (B, S) -> rows; fold the linear bias into the positional embedding.
    x2 = x.reshape(rows, In)
    w_t = _pad_axis(weight.T, 1, Np)                                          # (In, Np)
    pe_s = _pad_axis(pos_emb.reshape(S, Out) + bias.reshape(1, Out), 1, Np)   # (S, Np)
    g2 = _pad_axis(gamma.reshape(1, Out), 1, Np)                              # (1, Np)
    b2 = _pad_axis(beta.reshape(1, Out), 1, Np)                               # (1, Np)

    if mxu_dtype is not None:
        x2 = x2.astype(mxu_dtype)
        w_t = w_t.astype(mxu_dtype)

    # ---- choose a row tile ---------------------------------------------------------
    # Prefer a tile that divides S: then tr | rows (no row padding) and the positional
    # embedding never has to be materialized at (B*S, Np) — each row block maps to pe
    # block (r % (S // tr)).
    cap = max_row_tile if B >= 2 else max(sub, S // 2)   # keep >=2 grid steps if we can
    tr = _largest_dividing_tile(S, sub, cap)
    if tr is None and B == 1:
        tr = _largest_dividing_tile(S, sub, max_row_tile)

    if tr is not None:
        # Mode A: tr | S  =>  tr | rows, no row padding, pe stays (S, Np).
        rows_p = rows
        pe = pe_s
        n_pe_blocks = S // tr
        pe_spec = pl.BlockSpec((tr, Np), lambda r: (r % n_pe_blocks, 0))
    else:
        # Mode B (fallback, e.g. S=77): broadcast pe across batch; keep >=2 grid steps.
        n_steps = max(2, -(-rows // max_row_tile))
        tr = _round_up(-(-rows // n_steps), sub)
        rows_p = _round_up(rows, tr)
        pe = _pad_axis(jnp.broadcast_to(pe_s[None], (B, S, Np)).reshape(rows, Np),
                       0, rows_p)
        pe_spec = pl.BlockSpec((tr, Np), lambda r: (r, 0))

    x2 = _pad_axis(x2, 0, rows_p)
    grid = (rows_p // tr,)

    # VMEM budget (v7x has only 64 MiB physical: derive from tiles, cap at 48 MiB).
    in_item = jnp.dtype(x2.dtype).itemsize
    out_item = jnp.dtype(x.dtype).itemsize
    est = (2 * tr * In * in_item          # double-buffered x tiles
           + 2 * tr * Np * 4              # double-buffered pe tiles
           + 2 * tr * Np * out_item       # double-buffered out tiles
           + In * Np * in_item            # single-buffered weight
           + 4 * Np * 4                   # gamma / beta
           + 6 * tr * Np * 4)             # compiler-managed f32 intermediates
    vmem_limit = int(min(48 * 1024 * 1024, max(2 * est, 16 * 1024 * 1024)))

    out = pl.pallas_call(
        functools.partial(_positional_linear_kernel,
                          out_features=Out, padded_features=Np),
        out_shape=jax.ShapeDtypeStruct((rows_p, Np), x.dtype),
        grid=grid,
        in_specs=[
            pl.BlockSpec((tr, In), lambda r: (r, 0)),                # x row tile (true K)
            pl.BlockSpec((In, Np), lambda r: (0, 0),
                         pipeline_mode=pl.Buffered(1)),              # weight, single buffer
            pe_spec,                                                 # pos_emb(+bias) tile
            pl.BlockSpec((1, Np), lambda r: (0, 0),
                         pipeline_mode=pl.Buffered(1)),              # ln gamma
            pl.BlockSpec((1, Np), lambda r: (0, 0),
                         pipeline_mode=pl.Buffered(1)),              # ln beta
        ],
        out_specs=pl.BlockSpec((tr, Np), lambda r: (r, 0)),
        compiler_params=pltpu.CompilerParams(
            dimension_semantics=("parallel",),
            vmem_limit_bytes=vmem_limit,
        ),
    )(x2, w_t, pe, g2, b2)

    if rows_p == rows and Np == Out:
        return out.reshape(B, S, Out)        # no padding applied: avoid the slice copy
    return out[:rows, :Out].reshape(B, S, Out)


def _reference(x, weight, bias, pos_emb, gamma, beta):
    y = jnp.einsum("bsi,oi->bso", x, weight) + bias
    y = y + pos_emb
    mean = jnp.mean(y, axis=-1, keepdims=True)
    var = jnp.mean((y - mean) ** 2, axis=-1, keepdims=True)
    y = (y - mean) * jax.lax.rsqrt(var + LN_EPS)
    return y * gamma + beta


if __name__ == "__main__":
    # Small shapes consistent with the module: (B, seq_len, in_features)
    B, S, IN, OUT = 2, 8, 32, 64

    key = jax.random.PRNGKey(0)
    k_x, k_w, k_b, k_pe = jax.random.split(key, 4)

    x = jax.random.normal(k_x, (B, S, IN), dtype=jnp.float32)

    # Deterministic parameter init (shapes from __init__):
    #   nn.Linear(in_features, out_features): weight (Out, In), bias (Out,)
    bound = 1.0 / jnp.sqrt(IN)
    weight = jax.random.uniform(k_w, (OUT, IN), minval=-bound, maxval=bound,
                                dtype=jnp.float32)
    bias = jax.random.uniform(k_b, (OUT,), minval=-bound, maxval=bound,
                              dtype=jnp.float32)
    #   positional_embedding (1, seq_len, out_features), trunc_normal std=0.02
    pos_emb = 0.02 * jax.random.truncated_normal(k_pe, -2.0, 2.0, (1, S, OUT),
                                                 dtype=jnp.float32)
    #   nn.LayerNorm(out_features): gamma ones, beta zeros (PyTorch defaults)
    gamma = jnp.ones((OUT,), dtype=jnp.float32)
    beta = jnp.zeros((OUT,), dtype=jnp.float32)

    out = positional_linear(x, weight, bias, pos_emb, gamma, beta)
    out = jax.block_until_ready(out)

    ref = _reference(x, weight, bias, pos_emb, gamma, beta)
    assert out.shape == (B, S, OUT)
    assert jnp.allclose(out, ref, atol=1e-4, rtol=1e-4), "mismatch vs reference"

    print("KERNEL_OK")
</pallas_src>

<mosaic_0001>
module attributes {stable_mosaic.version = 11 : i64} {
  func.func @_positional_linear_kernel(%arg0: i32, %arg1: memref<8x32xf32, #tpu.memory_space<vmem>>, %arg2: memref<32x128xf32, #tpu.memory_space<vmem>>, %arg3: memref<8x128xf32, #tpu.memory_space<vmem>>, %arg4: memref<1x128xf32, #tpu.memory_space<vmem>>, %arg5: memref<1x128xf32, #tpu.memory_space<vmem>>, %arg6: memref<8x128xf32, #tpu.memory_space<vmem>>) attributes {dimension_semantics = [#tpu.dimension_semantics<parallel>], iteration_bounds = array<i64: 2>, scalar_prefetch = 0 : i64, scratch_operands = 0 : i64, tpu.core_type = #tpu.core_type<tc>, window_params = [{transform_indices = @transform_0, window_bounds = array<i64: 8, 32>}, {pipeline_mode = #tpu.pipeline_mode<synchronous>, transform_indices = @transform_1, window_bounds = array<i64: 32, 128>}, {transform_indices = @transform_2, window_bounds = array<i64: 8, 128>}, {pipeline_mode = #tpu.pipeline_mode<synchronous>, transform_indices = @transform_3, window_bounds = array<i64: 1, 128>}, {pipeline_mode = #tpu.pipeline_mode<synchronous>, transform_indices = @transform_4, window_bounds = array<i64: 1, 128>}, {transform_indices = @transform_5, window_bounds = array<i64: 8, 128>}]} {
    %c0 = arith.constant 0 : index
    %c0_0 = arith.constant 0 : index
    %0 = vector.load %arg1[%c0, %c0_0] : memref<8x32xf32, #tpu.memory_space<vmem>>, vector<8x32xf32>
    %c0_1 = arith.constant 0 : index
    %c0_2 = arith.constant 0 : index
    %1 = vector.load %arg2[%c0_1, %c0_2] : memref<32x128xf32, #tpu.memory_space<vmem>>, vector<32x128xf32>
    %cst = arith.constant dense<0.000000e+00> : vector<8x128xf32>
    %2 = tpu.matmul %0, %1, %cst {dimension_numbers = #tpu.dot_dimension_numbers<[1], [0], [0], [1], [0, 0, 1, 1], [], []>} : vector<8x32xf32>, vector<32x128xf32>, vector<8x128xf32> -> vector<8x128xf32>
    %c0_3 = arith.constant 0 : index
    %c0_4 = arith.constant 0 : index
    %3 = vector.load %arg3[%c0_3, %c0_4] : memref<8x128xf32, #tpu.memory_space<vmem>>, vector<8x128xf32>
    %4 = arith.addf %2, %3 : vector<8x128xf32>
    %cst_5 = arith.constant dense<0.000000e+00> : vector<8xf32>
    %5 = vector.multi_reduction <add>, %4, %cst_5 [1] : vector<8x128xf32> to vector<8xf32>
    %6 = vector.shape_cast %5 : vector<8xf32> to vector<8x1xf32>
    %cst_6 = arith.constant 1.562500e-02 : f32
    %7 = vector.broadcast %cst_6 : f32 to vector<8x1xf32>
    %8 = arith.mulf %6, %7 : vector<8x1xf32>
    %9 = vector.broadcast %8 : vector<8x1xf32> to vector<8x128xf32>
    %10 = arith.subf %4, %9 : vector<8x128xf32>
    %11 = tpu.iota {dimensions = array<i32: 1>} : vector<8x128xi32>
    %c64_i32 = arith.constant 64 : i32
    %12 = vector.broadcast %c64_i32 : i32 to vector<8x128xi32>
    %13 = arith.cmpi slt, %11, %12 : vector<8x128xi32>
    %cst_7 = arith.constant 0.000000e+00 : f32
    %14 = vector.broadcast %cst_7 : f32 to vector<8x128xf32>
    %15 = arith.select %13, %10, %14 : vector<8x128xi1>, vector<8x128xf32>
    %16 = arith.mulf %15, %15 : vector<8x128xf32>
    %cst_8 = arith.constant dense<0.000000e+00> : vector<8xf32>
    %17 = vector.multi_reduction <add>, %16, %cst_8 [1] : vector<8x128xf32> to vector<8xf32>
    %18 = vector.shape_cast %17 : vector<8xf32> to vector<8x1xf32>
    %cst_9 = arith.constant 1.562500e-02 : f32
    %19 = vector.broadcast %cst_9 : f32 to vector<8x1xf32>
    %20 = arith.mulf %18, %19 : vector<8x1xf32>
    %cst_10 = arith.constant 9.99999974E-6 : f32
    %21 = vector.broadcast %cst_10 : f32 to vector<8x1xf32>
    %22 = arith.addf %20, %21 : vector<8x1xf32>
    %23 = math.rsqrt %22 : vector<8x1xf32>
    %24 = vector.broadcast %23 : vector<8x1xf32> to vector<8x128xf32>
    %25 = arith.mulf %15, %24 : vector<8x128xf32>
    %c0_11 = arith.constant 0 : index
    %c0_12 = arith.constant 0 : index
    %26 = vector.load %arg4[%c0_11, %c0_12] : memref<1x128xf32, #tpu.memory_space<vmem>>, vector<1x128xf32>
    %27 = vector.broadcast %26 : vector<1x128xf32> to vector<8x128xf32>
    %28 = arith.mulf %25, %27 : vector<8x128xf32>
    %c0_13 = arith.constant 0 : index
    %c0_14 = arith.constant 0 : index
    %29 = vector.load %arg5[%c0_13, %c0_14] : memref<1x128xf32, #tpu.memory_space<vmem>>, vector<1x128xf32>
    %30 = vector.broadcast %29 : vector<1x128xf32> to vector<8x128xf32>
    %31 = arith.addf %28, %30 : vector<8x128xf32>
    %c0_15 = arith.constant 0 : index
    %c0_16 = arith.constant 0 : index
    %32 = vector.load %arg6[%c0_15, %c0_16] : memref<8x128xf32, #tpu.memory_space<vmem>>, vector<8x128xf32>
    tpu.vector_store %arg6[%c0_15, %c0_16], %31 {strides = array<i32>} : memref<8x128xf32, #tpu.memory_space<vmem>>, vector<8x128xf32>,
    return
  }
  func.func @transform_0(%arg0: i32) -> (i32, i32) {
    %c0_i32 = arith.constant 0 : i32
    %c0_i32_0 = arith.constant 0 : i32
    return %arg0, %c0_i32 : i32, i32
  }
  func.func @transform_1(%arg0: i32) -> (i32, i32) {
    %c0_i32 = arith.constant 0 : i32
    %c0_i32_0 = arith.constant 0 : i32
    %c0_i32_1 = arith.constant 0 : i32
    return %c0_i32, %c0_i32_0 : i32, i32
  }
  func.func @transform_2(%arg0: i32) -> (i32, i32) {
    %c1_i32 = arith.constant 1 : i32
    %c0_i32 = arith.constant 0 : i32
    %0 = arith.cmpi eq, %c1_i32, %c0_i32 : i32
    %c1_i32_0 = arith.constant 1 : i32
    %1 = arith.select %0, %c1_i32_0, %c1_i32 : i32
    %2 = arith.remsi %arg0, %1 : i32
    %c0_i32_1 = arith.constant 0 : i32
    %3 = arith.cmpi ne, %2, %c0_i32_1 : i32
    %c0_i32_2 = arith.constant 0 : i32
    %4 = arith.cmpi slt, %2, %c0_i32_2 : i32
    %c0_i32_3 = arith.constant 0 : i32
    %5 = arith.cmpi slt, %1, %c0_i32_3 : i32
    %6 = arith.xori %4, %5 : i1
    %7 = arith.andi %6, %3 : i1
    %8 = arith.addi %2, %1 : i32
    %9 = arith.select %7, %8, %2 : i32
    %c0_i32_4 = arith.constant 0 : i32
    %c0_i32_5 = arith.constant 0 : i32
    return %9, %c0_i32_4 : i32, i32
  }
  func.func @transform_3(%arg0: i32) -> (i32, i32) {
    %c0_i32 = arith.constant 0 : i32
    %c0_i32_0 = arith.constant 0 : i32
    %c0_i32_1 = arith.constant 0 : i32
    return %c0_i32, %c0_i32_0 : i32, i32
  }
  func.func @transform_4(%arg0: i32) -> (i32, i32) {
    %c0_i32 = arith.constant 0 : i32
    %c0_i32_0 = arith.constant 0 : i32
    %c0_i32_1 = arith.constant 0 : i32
    return %c0_i32, %c0_i32_0 : i32, i32
  }
  func.func @transform_5(%arg0: i32) -> (i32, i32) {
    %c0_i32 = arith.constant 0 : i32
    %c0_i32_0 = arith.constant 0 : i32
    return %arg0, %c0_i32 : i32, i32
  }
}

</mosaic_0001>

<bundles_post_ra>
// kernel: tpu_custom_call.1
= control target key start
LH: loop header
LB: loop body
LE: loop exit
PB: predicated region body
PF: predicated region fallthrough
CT: control target
= control target key end

     0   :  { %10 = vsyncpa [#allocation3], 0  ;;  %s953_s0 = inlined_call_operand.hbm [shape: f32[16,32], index: 0, kind: input, shape index: {}]   ;;  %s954_s1 = inlined_call_operand.hbm [shape: f32[32,128], index: 1, kind: input, shape index: {}]   ;;  %s955_s2 = inlined_call_operand.hbm [shape: f32[8,128], index: 2, kind: input, shape index: {}]   ;;  %s956_s3 = inlined_call_operand.vmem [shape: f32[1,128], index: 3, kind: input, shape index: {}]   ;;  %s957_s4 = inlined_call_operand.vmem [shape: f32[1,128], index: 4, kind: input, shape index: {}]   ;;  %s958_s5 = inlined_call_operand.hbm [shape: f32[16,128], index: 5, kind: output, shape index: {}]  }
   0x1   :  { %12 = vsyncpa [#allocation3 + $0x1], 0 }
   0x2   :  { %13 = vsyncpa [#allocation6], 0 }
   0x3   :  { %14 = vsyncpa [#allocation4], 0 }
   0x4   :  { %16 = vsyncpa [#allocation4 + $0x1], 0  ;;  %s778_s18 = smov 0   ;;  %s780_s19 = smov 0  }
   0x5   :  { %s782_s20 = smov 0   ;;  %s784_s21 = smov 0  }
   0x6 LB: > { %s799_s22 = sadd.s32 4294967295, %s738_s21   ;;  %s482_s23 = sadd.s32 4294967294, %s738_s21   ;;  %s738_s21 = sphi %s784_s21, %s980_s21   ;;  %s734_s20 = sphi %s782_s20, %s979_s20   ;;  %s730_s19 = sphi %s780_s19, %s978_s19   ;;  %s726_s18 = sphi %s778_s18, %s977_s18  }
   0x7   : > { %p42_p0 = scmp.ne.s32.totalorder %s730_s19, %s726_s18  ;;  %p959_p1 = scmp.eq.s32.totalorder %s799_s22, 0 }
   0x8   : > { %p156_p3 = scmp.eq.s32.totalorder %s482_s23, 1  ;;  %p483_p5 = scmp.ge.s32.totalorder %s738_s21, 1 }
   0x9   : > { %p808_p4 = por %p959_p1, %p42_p0  ;;  %p163_p7 = scmp.lt.s32.totalorder %s738_s21, 3 }
   0xa   : > { %p813_p6 = por %p156_p3, %p42_p0  ;;  %s740_s27 = smov [#allocation5]  }
   0xb   : > { %s963_s24 = scalar_select %p808_p4, 1, 0 }
   0xc   : > { %s964_s25 = scalar_select %p813_p6, 1, 0 }
   0xd   : > { %p818_p8 = pnand %p483_p5, %p163_p7  ;;  %s175_s28 = sshll.u32 %s740_s27, 4  ;;  %s176_s28 = int_to_ptr.vmem [resolvable:$true] %s175_s28 }
   0xe   : > { %s741_s30 = smov [#allocation7]   ;;  %s601_s7 = scalar_lea.vmem %s176_s28, 512 }
   0xf   : > { %s965_s26 = scalar_select %p818_p8, 1, 0 }
  0x10   : > { %p529_p9 = pneg %p818_p8  ;;  %s189_s6 = sshll.u32 %s741_s30, 4  ;;  %s190_s6 = int_to_ptr.vmem [resolvable:$true] %s189_s6 }
  0x11   : > { %p602_p13 = scmp.ne.s32.totalorder %s176_s28, %s601_s7  ;;  %p609_p5 = scmp.lt.s32.totalorder %s176_s28, %s176_s28 }
  0x12   : > { %p827_p11 = pnand %p529_p9, %p959_p1  ;;  %p610_p7 = scmp.lt.s32.totalorder %s601_s7, %s601_s7 }
  0x14   : > { %p592_p12 = pneg %p827_p11  ;;  %p611_p10 = por %p610_p7, %p609_p5 }
  0x16   : > { %p604_p0 = pnand %p602_p13, %p592_p12 }
  0x18   : > { %p605_p3 = pneg %p604_p0 }
  0x1a   : > { %p612_p9 = pnand %p611_p10, %p605_p3 }
  0x1c   : > { %615 = shalt.err (!%p612_p9)
}
  0x1d   : > { %s742_s8 = smov 128   ;;  %s743_s9 = smov 8  }
  0x1e   : > { %532 = dma.hbm_to_vmem [thread:$0]  (!%p827_p11), %s954_s1, 512, %s176_s28, [#allocation6], %s742_s8, %s742_s8, %s743_s9  }
  0x1f   : > { %s627_s12 = scalar_lea.vmem %s190_s6, 128  ;;  %p635_p2 = scmp.lt.s32.totalorder %s190_s6, %s190_s6 }
  0x20   : > { %p628_p1 = scmp.ne.s32.totalorder %s190_s6, %s627_s12  ;;  %p636_p6 = scmp.lt.s32.totalorder %s627_s12, %s627_s12 }
  0x22   : > { %p630_p13 = pnand %p628_p1, %p592_p12  ;;  %p637_p5 = por %p636_p6, %p635_p2 }
  0x24   : > { %p631_p0 = pneg %p630_p13 }
  0x26   : > { %p638_p10 = pnand %p637_p5, %p631_p0 }
  0x28   : > { %641 = shalt.err (!%p638_p10)
}
  0x29   : > { %535 = dma.hbm_to_vmem [thread:$0]  (!%p827_p11), %s955_s2, 128, %s190_s6, [#allocation6]  }
  0x2a   : > { %s850_s15 = sadd.s32 1, %s738_s21   ;;  %s29_s16 = sadd.s32 1, %s734_s20 }
  0x2b   : > { %s26_s17 = ssub.s32 %s738_s21, %s850_s15  ;;  %p36_p1 = scmp.ne.s32.totalorder %s734_s20, %s730_s19 }
  0x2c   : > { %p27_p2 = scmp.eq.s32.totalorder %s26_s17, 0  ;;  %p37_p6 = scmp.eq.s32.totalorder %s738_s21, 0 }
  0x2d   : > { %p967_p12 = scmp.eq.s32.totalorder %s799_s22, 1  ;;  %p546_p7 = scmp.lt.s32.totalorder %s738_s21, 2 }
  0x2e   : > { %s866_s27 = scalar_select %p27_p2, %s734_s20, %s29_s16  }
  0x2f   : > { %p860_p3 = por %p967_p12, %p36_p1  ;;  %p38_p9 = por %p37_p6, %p36_p1 }
  0x30   : > { %s206_s28 = sand.u32 1, %s734_s20   ;;  %s488_s30 = sshll.u32 %s738_s21, 7 }
  0x31   : > { %s968_s23 = scalar_select %p860_p3, 1, 0 }
  0x32   : > { %s487_s29 = sshll.u32 %s206_s28, 3  ;;  %s873_s8 = scalar_lea.hbm %s953_s0, %s488_s30 }
  0x33   : > { %s210_s9 = scalar_lea.vmem [#allocation2], %s487_s29  ;;  %p875_p11 = pnand %p546_p7, %p38_p9 }
  0x34   : > { %s217_s10 = sshll.u32 %s210_s9, 4  ;;  %s207_s12 = scalar_lea.sflag [#allocation3], %s206_s28  ;;  %s218_s10 = int_to_ptr.vmem [resolvable:$true] %s217_s10 }
  0x35   : > { %s642_s13 = scalar_lea.hbm %s873_s8, 128  ;;  %p644_p0 = pneg %p875_p11 }
  0x36   : > { %p643_p13 = scmp.ne.s32.totalorder %s873_s8, %s642_s13  ;;  %s647_s17 = scalar_lea.hbm %s953_s0, 256 }
  0x37   : > { %p648_p1 = scmp.lt.s32.totalorder %s873_s8, %s953_s0  ;;  %p649_p2 = scmp.lt.s32.totalorder %s647_s17, %s642_s13 }
  0x38   : > { %p645_p5 = pnand %p644_p0, %p643_p13 }
  0x39   : > { %p650_p6 = por %p649_p2, %p648_p1 }
  0x3a   : > { %p646_p10 = pneg %p645_p5 }
  0x3c   : > { %p651_p12 = pnand %p650_p6, %p646_p10 }
  0x3e   : > { %654 = shalt.err (!%p651_p12)
}
  0x3f   : > { %s655_s6 = scalar_lea.vmem %s218_s10, 128  ;;  %s744_s28 = smov [#allocation2]  }
  0x40   : > { %p656_p7 = scmp.ne.s32.totalorder %s218_s10, %s655_s6  ;;  %s660_s7 = sshll.u32 %s744_s28, 4  ;;  %s661_s7 = int_to_ptr.vmem [resolvable:$false] %s660_s7 }
  0x41   : > { %s662_s9 = scalar_lea.vmem %s661_s7, 256  ;;  %p663_p13 = scmp.lt.s32.totalorder %s218_s10, %s661_s7 }
  0x42   : > { %p658_p9 = pnand %p656_p7, %p644_p0  ;;  %p664_p5 = scmp.lt.s32.totalorder %s662_s9, %s655_s6 }
  0x44   : > { %p659_p3 = pneg %p658_p9  ;;  %p665_p4 = por %p664_p5, %p663_p13 }
  0x46   : > { %p666_p8 = pnand %p665_p4, %p659_p3 }
  0x48   : > { %669 = shalt.err (!%p666_p8)
}
  0x49   : > { %539 = dma.hbm_to_vmem [thread:$0]  (!%p875_p11), %s873_s8, 128, %s218_s10, %s207_s12  }
  0x4a   : > { %p970_p10 = scmp.ne.s32.totalorder %s965_s26, 0 }
  0x4b   : > { %s896_s13 = sand.u32 (!%p970_p10), 1, %s730_s19   ;;  %p971_p4 = scmp.ne.s32.totalorder (!%p970_p10), %s963_s24, 0 }
  0x4c   : > { %226 = sbr.rel (%p970_p10) target bundleno = 609 (0x261), region = 40  ;;  %s490_s14 = sshll.u32 (!%p970_p10), %s896_s13, 3 }
  0x4d   : > { %s229_s16 = scalar_lea.sflag (!%p970_p10), [#allocation3], %s896_s13  ;;  %s232_s17 = scalar_lea.vmem (!%p970_p10), [#allocation2], %s490_s14 }
  0x51   : > { %713 = dma.done.wait (%p971_p4), %s229_s16, 128  }
  0x52   : > { %715 = vsyncadd (%p971_p4), %s229_s16, 4294967168  ;;  %p972_p8 = scmp.eq.s32.totalorder %s799_s22, 0 }
  0x54   : > { %717 = dma.done.wait (%p972_p8), [#allocation6], 640   ;;  %p973_p3 = pmov %p972_p8 }
  0x55   : > { %v745_v0 = vmov 0.0   ;;  %vm746_vm0 = vmmov 0   ;;  %v271_v1 = vld [vmem:[#allocation5 + $0x18] sm:$0xff]  ;;  %v270_v2 = vld [vmem:[#allocation5 + $0x10] sm:$0xff]  ;;  %v269_v3 = vld [vmem:[#allocation5 + $0x8] sm:$0xff]  ;;  %vm273_vm1 = vcmask 261120   ;;  %v351_v10 = vlaneseq }
  0x56   : > { %719 = vsyncadd (%p973_p3), [#allocation6], 4294966656  ;;  %506 = vmatprep.subr.mxu0 %v745_v0  ;;  %514 = vmatprep.mubr.msk.f32.mxu0 %vm746_vm0, %v745_v0  ;;  %v268_v4 = vld [vmem:[#allocation5] sm:$0xff]  ;;  %v267_v5 = vld [vmem:[%s232_s17] sm:$0xff]  ;;  %s498_s11 = sshll.u32 %s799_s22, 7  ;;  %s266_s12 = scalar_lea.vmem [#allocation8], %s490_s14 }
  0x57   : > { %507 = vmatpush3.msra.mxu0 %v271_v1  ;;  %v272_v6 = vld [vmem:[#allocation7] sm:$0xff]  ;;  %v352_v11 = vand.u32 127, %v351_v10  ;;  %v495_v21 = vld [vmem:[%s956_s3] ss:$0 sm:$0xff]  ;;  %s393_s30 = sshll.u32 %s266_s12, 4  ;;  %s391_s28 = scalar_lea.hbm %s958_s5, %s498_s11  ;;  %s394_s30 = int_to_ptr.vmem [resolvable:$true] %s393_s30 }
  0x58   : > { %508 = vmatprep.subr.mxu0 %v745_v0  ;;  %v496_v23 = vld [vmem:[%s957_s4] ss:$0 sm:$0xff]  ;;  %s380_s7 = scalar_lea.sflag [#allocation4], %s896_s13  ;;  %s670_s9 = scalar_lea.vmem %s394_s30, 128 }
  0x59   : > { %509 = vmatpush3.msra.mxu0 %v270_v2  ;;  %vm353_vm2 = vcmp.lt.s32.totalorder %v352_v11, 64  ;;  %p671_p11 = scmp.ne.s32.totalorder %s394_s30, %s670_s9  ;;  %p974_p0 = scmp.ne.s32.totalorder %s968_s23, 0 }
  0x5a   : > { %510 = vmatprep.subr.mxu0 %v745_v0  ;;  %s747_s16 = smov [#allocation8]  }
  0x5b   : > { %511 = vmatpush3.msra.mxu0 %v269_v3  ;;  %p672_p1 = pnand %p671_p11, %p974_p0  ;;  %s674_s17 = sshll.u32 %s747_s16, 4  ;;  %s675_s17 = int_to_ptr.vmem [resolvable:$false] %s674_s17 }
  0x5c   : > { %512 = vmatprep.subr.mxu0 %v745_v0  ;;  %s676_s22 = scalar_lea.vmem %s675_s17, 256  ;;  %p677_p6 = scmp.lt.s32.totalorder %s394_s30, %s675_s17 }
  0x5d   : > { %513 = vmatpush3.msra.mxu0 %v268_v4  ;;  %p673_p2 = pneg %p672_p1  ;;  %p678_p12 = scmp.lt.s32.totalorder %s676_s22, %s670_s9 }
  0x5e   : > { %515 = vmatmul.mubr.msk.f32.vlgmr.msra.gmra.mxu0 %vm273_vm1, %v267_v5 }
  0x5f   : > { %p679_p7 = por %p678_p12, %p677_p6 }
  0x61   : > { %p680_p9 = pnand %p679_p7, %p673_p2 }
 0x11e   : > { %v343_v7 = vpop.f32.mrf.mxu0 }
 0x11f   : > { %v344_v8 = vadd.f32 %v343_v7, %v272_v6 }
 0x120   : > { %v516_v9 = vpop.f32.mrf.mxu0 }
 0x121   : > { %347 = vadd.xlane.f32.xlu0 %v344_v8 }
 0x1aa   : > { %v348_v12 = vpop.xlane.xlu0 %347 }
 0x1ab   : > { %v349_v13 = vmul.f32 0.015625, %v348_v12 }
 0x1ad   : > { %v350_v14 = vsub.f32 %v344_v8, %v349_v13 }
 0x1af   : > { %v354_v15 = vsel %vm353_vm2, %v350_v14, 0.0 }
 0x1b0   : > { %v355_v16 = vmul.f32 %v354_v15, %v354_v15 }
 0x1b2   : > { %356 = vadd.xlane.f32.xlu0 %v355_v16 }
 0x23b   : > { %v357_v17 = vpop.xlane.xlu0 %356 }
 0x23c   : > { %v358_v18 = vmul.f32 0.015625, %v357_v17 }
 0x23e   : > { %v359_v19 = vadd.f32 1e-05, %v358_v18 }
 0x240   : > { %588 = vrsqrt.f32 %v359_v19 }
 0x24d   : > { %v589_v20 = vpop.eup %588 }
 0x24e   : > { %v361_v22 = vmul.f32 %v589_v20, %v354_v15 }
 0x250   : > { %v369_v24 = vmul.f32 %v495_v21, %v361_v22 }
 0x252   : > { %v377_v25 = vadd.f32 %v496_v23, %v369_v24 }
 0x254   : > { %378 = vst [vmem:[%s266_s12] sm:$0xff] %v377_v25 }
 0x255   : > { %683 = shalt.err (!%p680_p9)
}
 0x256   : > { %s684_s14 = scalar_lea.hbm %s391_s28, 128  ;;  %s688_s26 = scalar_lea.hbm %s958_s5, 256 }
 0x257   : > { %p685_p13 = scmp.ne.s32.totalorder %s391_s28, %s684_s14  ;;  %p689_p4 = scmp.lt.s32.totalorder %s391_s28, %s958_s5 }
 0x258   : > { %p690_p8 = scmp.lt.s32.totalorder %s688_s26, %s684_s14 }
 0x259   : > { %p686_p5 = pnand %p685_p13, %p974_p0 }
 0x25a   : > { %p691_p3 = por %p690_p8, %p689_p4 }
 0x25b   : > { %p687_p10 = pneg %p686_p5 }
 0x25d   : > { %p692_p11 = pnand %p691_p3, %p687_p10 }
 0x25f   : > { %695 = shalt.err (!%p692_p11)
}
 0x260   : > { %527 = dma.vmem_to_hbm [thread:$0]  (%p974_p0), %s394_s30, 128, %s391_s28, %s380_s7  }
 0x261 PF: > { %s405_s11 = sand.u32 1, %s726_s18   ;;  %p975_p1 = scmp.ne.s32.totalorder %s964_s25, 0 }
 0x262   : > { %p976_p2 = scmp.ge.s32.totalorder %s738_s21, 2  ;;  %s406_s12 = scalar_lea.sflag [#allocation4], %s405_s11 }
 0x264   : > { %p541_p6 = pnand %p976_p2, %p975_p1 }
 0x266   : > { %p542_p12 = pneg %p541_p6 }
 0x268   : > { %721 = dma.done.wait (%p542_p12), %s406_s12, 128  }
 0x269   : > { %723 = vsyncadd (%p542_p12), %s406_s12, 4294967168  ;;  %p19_p7 = scmp.ge.s32.totalorder %s850_s15, 4   ;;  %s977_s18 = smov %s730_s19 }
 0x26a   : > { %s978_s19 = smov %s734_s20  ;;  %s979_s20 = smov %s866_s27 }
 0x26b   : > { %s980_s21 = smov %s850_s15  ;;  %21 = sbr.rel (!%p19_p7) target bundleno = 6 (0x6), region = 93 }
 0x270   :  { %411 = vsyncpa [#allocation3], 1 }
 0x271   :  { %413 = vsyncpa [#allocation3 + $0x1], 1 }
 0x272   :  { %414 = vsyncpa [#allocation6], 1 }
 0x273   :  { %415 = vsyncpa [#allocation4], 1 }
 0x274   :  { %417 = vsyncpa [#allocation4 + $0x1], 1 }

</bundles_post_ra>
